<compile_context>
chip_gen: v6e
topology: v6e:2x2x1
jax: 0.10.0
libtpu: 0.0.40
codegen_flags: <defaults>
</compile_context>

<pallas_src>
import math
import jax
import jax.numpy as jnp
from jax.experimental import pallas as pl
from jax.experimental.pallas import tpu as pltpu


def _pos_embed_add_kernel(x_ref, pos_ref, o_ref):
    # x_ref:   (TB, TD) lane-dense tile of flattened activations (x dtype)
    # pos_ref: (1, TD)  positional tile in its native (f32) dtype, broadcast over TB
    # Accumulate in f32 on the VPU, cast once on store.
    x = x_ref[...].astype(jnp.float32)
    p = pos_ref[...].astype(jnp.float32)
    o_ref[...] = (x + p).astype(o_ref.dtype)


def _pick_tile(n, quantum, max_tile):
    """Largest multiple of `quantum` that divides n and is <= max_tile; None if n % quantum."""
    if quantum <= 0 or n % quantum != 0:
        return None
    t = min(n, max(quantum, (max_tile // quantum) * quantum))
    while t >= quantum:
        if n % t == 0:
            return t
        t -= quantum
    return None


def _vmem_budget_bytes():
    """Usable VMEM budget with headroom; generation-aware, conservative fallback."""
    phys = 64 << 20  # v7x per-TC VMEM — the smallest of current gens
    try:
        info = pltpu.get_tpu_info()
        phys = int(getattr(info, "vmem_capacity_bytes", phys)) or phys
    except Exception:
        pass
    # ~30% headroom for Mosaic internals; 48 MiB ceiling is comfortable on
    # v5e/v6e (128 MiB physical) and still under v7x's 64 MiB per TC.
    return min(int(phys * 0.7), 48 << 20)


def _positional_embedding_pallas(x, pos_embedding):
    """Returns x + pos[:, :S, :] via Pallas, or None if no safe tiling exists."""
    B, S, D = x.shape
    seq_total = pos_embedding.shape[1]
    assert S <= seq_total, "input sequence longer than positional table"
    N = S * D
    itemsize = jnp.dtype(x.dtype).itemsize
    pos_itemsize = jnp.dtype(pos_embedding.dtype).itemsize

    budget = _vmem_budget_bytes()
    # x + out tiles are each double-buffered => ~4x block bytes, plus the small pos
    # tile; target one block at ~budget/6, capped at 8 MiB (HBM-bound roofline is
    # already ~86%+ there, bigger only adds VMEM pressure).
    target_block_bytes = max(64 << 10, min(8 << 20, budget // 6))

    # dtype-aware sublane quantum: f32 -> 8, bf16 -> 16, int8/fp8 -> 32.
    q = max(8, 32 // itemsize)

    # Lane axis first (DMA contiguity): take the full flattened row when a q-row
    # block of full rows fits the target, else the largest 128-multiple divisor.
    if N * itemsize * q <= target_block_bytes:
        td = N
    else:
        td = _pick_tile(N, 128, max(128, target_block_bytes // (q * itemsize)))
        if td is None:
            # N not a multiple of 128: full-dim lane block is the only legal choice
            # (masked stores; correct but slower — flagged, not a tuned config).
            td = N

    # Batch/row axis: fill the remaining block budget.
    max_tb = max(q, target_block_bytes // max(1, td * itemsize))
    tb = _pick_tile(B, q, max_tb)
    if tb is None and q != 8:
        tb = _pick_tile(B, 8, max_tb)  # bf16/int8 path with B % q != 0 but B % 8 == 0
    if tb is None:
        tb = B  # small / odd batch: full-dim block is legal

    # Hard VMEM-budget check covering the full-dim fallbacks above.
    block_bytes = tb * td * itemsize
    pos_block_bytes = td * pos_itemsize
    footprint = 4 * block_bytes + 2 * pos_block_bytes
    if footprint > budget:
        return None  # caller falls back to the plain XLA broadcast-add

    # Lane-dense flattening; pos stays in its native dtype (promotion happens in-kernel).
    x2 = x.reshape(B, N)
    if td % 128 == 0:
        # Address only the first S*D elements of the full flattened table through the
        # BlockSpec — no extra HBM pass from slicing/copying the table.
        pos2 = pos_embedding.reshape(1, seq_total * D)
    else:
        # td == N and N % 128 != 0: the pos array's last dim must equal td exactly.
        pos2 = jax.lax.slice(pos_embedding, (0, 0, 0), (1, S, D)).reshape(1, N)

    # Grid: lane-blocks outer, batch-row blocks inner, so the pos tile (which only
    # depends on the outer index) is reused across the inner steps.
    grid = (N // td, B // tb)

    out2 = pl.pallas_call(
        _pos_embed_add_kernel,
        out_shape=jax.ShapeDtypeStruct((B, N), x.dtype),
        grid_spec=pltpu.PrefetchScalarGridSpec(
            num_scalar_prefetch=0,
            grid=grid,
            in_specs=[
                pl.BlockSpec((tb, td), lambda j, i: (i, j)),   # x tile
                pl.BlockSpec((1, td), lambda j, i: (0, j)),    # pos tile (reused over i)
            ],
            out_specs=pl.BlockSpec((tb, td), lambda j, i: (i, j)),
        ),
        compiler_params=pltpu.CompilerParams(
            # Both axes are independent -> shard across both TensorCores on v7x.
            dimension_semantics=("parallel", "parallel"),
            vmem_limit_bytes=int(budget),
        ),
    )(x2, pos2)
    return out2.reshape(B, S, D)


def positional_embedding_forward(x, pos_embedding, *, min_pallas_bytes=4 << 20):
    """x: (B, S, D); pos_embedding: (1, seq_len+1, D). Returns x + pos[:, :S, :] in x.dtype.

    Note: a standalone mem-bound add always pays a full HBM round trip; if the
    consumer of this output is an XLA op that can fuse the broadcast-add, prefer
    the plain-add path (that is why min_pallas_bytes defaults high).
    """
    B, S, D = x.shape
    if x.size * jnp.dtype(x.dtype).itemsize >= min_pallas_bytes:
        out = _positional_embedding_pallas(x, pos_embedding)
        if out is not None:
            return out
    # Fallback: fused XLA broadcast-add (f32 accumulate, store in x.dtype).
    return (x.astype(jnp.float32)
            + pos_embedding[:, :S, :].astype(jnp.float32)).astype(x.dtype)


def init_pos_embedding(key, seq_len, embed_dim, dtype=jnp.float32):
    # Matches nn.init.uniform_(-val, val) with val = sqrt(6 / embed_dim).
    val = math.sqrt(6.0 / float(embed_dim))
    return jax.random.uniform(
        key, (1, seq_len + 1, embed_dim), dtype=dtype, minval=-val, maxval=val
    )


if __name__ == "__main__":
    key = jax.random.PRNGKey(0)
    k_x, k_p = jax.random.split(key)

    B, S, D = 2, 8, 32          # batch, input seq len, embed dim
    seq_len = 8                 # module's seq_len (pos table has seq_len+1 rows)

    x = jax.random.normal(k_x, (B, S, D), dtype=jnp.float32)
    pos_embedding = init_pos_embedding(k_p, seq_len, D)

    # Force the Pallas path even at this tiny size so the kernel is exercised.
    out = positional_embedding_forward(x, pos_embedding, min_pallas_bytes=0)
    out = jax.block_until_ready(out)
    ref = x + pos_embedding[:, :S, :]
    assert out.shape == (B, S, D)
    assert out.dtype == x.dtype
    assert jnp.allclose(out, ref, atol=1e-6), "f32 mismatch vs reference"

    # Mixed precision: bf16 activations with the f32 table; add happens in f32
    # inside the kernel and is stored back as bf16.
    x_bf16 = x.astype(jnp.bfloat16)
    out_bf16 = jax.block_until_ready(
        positional_embedding_forward(x_bf16, pos_embedding, min_pallas_bytes=0)
    )
    ref_bf16 = (x_bf16.astype(jnp.float32) + pos_embedding[:, :S, :]).astype(jnp.bfloat16)
    assert out_bf16.dtype == jnp.bfloat16
    assert jnp.allclose(
        out_bf16.astype(jnp.float32), ref_bf16.astype(jnp.float32), atol=1e-2
    ), "bf16 mismatch vs reference"

    # Default wrapper path at tiny shapes falls back to a plain fused XLA add.
    out_default = jax.block_until_ready(positional_embedding_forward(x, pos_embedding))
    assert jnp.allclose(out_default, ref, atol=1e-6)

    print("KERNEL_OK")
</pallas_src>

<mosaic_0001>
module attributes {stable_mosaic.version = 11 : i64} {
  func.func @_pos_embed_add_kernel(%arg0: i32, %arg1: i32, %arg2: memref<2x256xf32, #tpu.memory_space<vmem>>, %arg3: memref<1x256xf32, #tpu.memory_space<vmem>>, %arg4: memref<2x256xf32, #tpu.memory_space<vmem>>) attributes {dimension_semantics = [#tpu.dimension_semantics<parallel>, #tpu.dimension_semantics<parallel>], iteration_bounds = array<i64: 1, 1>, scalar_prefetch = 0 : i64, scratch_operands = 0 : i64, tpu.core_type = #tpu.core_type<tc>, window_params = [{transform_indices = @transform_0, window_bounds = array<i64: 2, 256>}, {transform_indices = @transform_1, window_bounds = array<i64: 1, 256>}, {transform_indices = @transform_2, window_bounds = array<i64: 2, 256>}]} {
    %c0 = arith.constant 0 : index
    %c0_0 = arith.constant 0 : index
    %0 = vector.load %arg2[%c0, %c0_0] : memref<2x256xf32, #tpu.memory_space<vmem>>, vector<2x256xf32>
    %c0_1 = arith.constant 0 : index
    %c0_2 = arith.constant 0 : index
    %1 = vector.load %arg3[%c0_1, %c0_2] : memref<1x256xf32, #tpu.memory_space<vmem>>, vector<1x256xf32>
    %2 = vector.broadcast %1 : vector<1x256xf32> to vector<2x256xf32>
    %3 = arith.addf %0, %2 : vector<2x256xf32>
    %c0_3 = arith.constant 0 : index
    %c0_4 = arith.constant 0 : index
    %4 = vector.load %arg4[%c0_3, %c0_4] : memref<2x256xf32, #tpu.memory_space<vmem>>, vector<2x256xf32>
    tpu.vector_store %arg4[%c0_3, %c0_4], %3 {strides = array<i32>} : memref<2x256xf32, #tpu.memory_space<vmem>>, vector<2x256xf32>,
    return
  }
  func.func @transform_0(%arg0: i32, %arg1: i32) -> (i32, i32) {
    %c0_i32 = arith.constant 0 : i32
    return %arg1, %arg0 : i32, i32
  }
  func.func @transform_1(%arg0: i32, %arg1: i32) -> (i32, i32) {
    %c0_i32 = arith.constant 0 : i32
    %c0_i32_0 = arith.constant 0 : i32
    return %c0_i32, %arg0 : i32, i32
  }
  func.func @transform_2(%arg0: i32, %arg1: i32) -> (i32, i32) {
    %c0_i32 = arith.constant 0 : i32
    return %arg1, %arg0 : i32, i32
  }
}

</mosaic_0001>

<bundles_post_ra>
// kernel: tpu_custom_call.1
= control target key start
LH: loop header
LB: loop body
LE: loop exit
PB: predicated region body
PF: predicated region fallthrough
CT: control target
= control target key end

     0   :  { %7 = vsyncpa [#allocation3], 0  ;;  %s172_s0 = inlined_call_operand.hbm [shape: f32[2,256], index: 0, kind: input, shape index: {}]   ;;  %s173_s1 = inlined_call_operand.hbm [shape: f32[1,288], index: 1, kind: input, shape index: {}]   ;;  %s174_s2 = inlined_call_operand.hbm [shape: f32[2,256], index: 2, kind: output, shape index: {}]  }
   0x1   :  { %8 = vsyncpa [#allocation6], 0 }
   0x2   :  { %9 = vsyncpa [#allocation4], 0  ;;  %s144_s9 = smov [#allocation2]   ;;  %s145_s11 = smov [#allocation5]  }
   0x3   :  { %s16_s10 = sshll.u32 %s144_s9, 4  ;;  %s26_s12 = sshll.u32 %s145_s11, 4  ;;  %s17_s10 = int_to_ptr.vmem [resolvable:$true] %s16_s10  ;;  %s27_s12 = int_to_ptr.vmem [resolvable:$true] %s26_s12 }
   0x4   :  { %s86_s13 = scalar_lea.vmem %s17_s10, 64  ;;  %p91_p1 = scmp.lt.s32.totalorder %s17_s10, %s17_s10 }
   0x5   :  { %p87_p0 = scmp.ne.s32.totalorder %s17_s10, %s86_s13  ;;  %p92_p2 = scmp.lt.s32.totalorder %s86_s13, %s86_s13 }
   0x7   :  { %p93_p3 = por %p92_p2, %p91_p1 }
   0x9   :  { %p94_p4 = pnand %p93_p3, %p87_p0 }
   0xb   :  { %97 = shalt.err (!%p94_p4)
}
   0xc   :  { %19 = dma.hbm_to_vmem [thread:$0]  %s172_s0, 64, %s17_s10, [#allocation3]  }
   0xd   :  { %s106_s16 = scalar_lea.vmem %s27_s12, 32  ;;  %p111_p6 = scmp.lt.s32.totalorder %s27_s12, %s27_s12 }
   0xe   :  { %p107_p5 = scmp.ne.s32.totalorder %s27_s12, %s106_s16  ;;  %p112_p7 = scmp.lt.s32.totalorder %s106_s16, %s106_s16 }
  0x10   :  { %p113_p8 = por %p112_p7, %p111_p6 }
  0x12   :  { %p114_p9 = pnand %p113_p8, %p107_p5 }
  0x14   :  { %117 = shalt.err (!%p114_p9)
}
  0x15   :  { %29 = dma.hbm_to_vmem [thread:$0]  %s173_s1, 32, %s27_s12, [#allocation6]  }
  0x16   :  { %138 = dma.done.wait [#allocation3], 64  }
  0x17   :  { %139 = vsyncadd [#allocation3], 4294967232 }
  0x18   :  { %140 = dma.done.wait [#allocation6], 32  }
  0x19   :  { %141 = vsyncadd [#allocation6], 4294967264  ;;  %v39_v0 = vlaneseq  ;;  %v146_v1 = vmov 1983009808   ;;  %v37_v7 = vld [vmem:[#allocation5] sm:$0x3] }
  0x1a   :  { %v49_v2 = vunpack.c.l.s4 %v146_v1  ;;  %v36_v12 = vld [vmem:[#allocation2] sm:$0xf]  ;;  %s147_s0 = smov [#allocation7]  }
  0x1b   :  { %v40_v3 = vshrl.u32 %v39_v0, 7  ;;  %s64_s19 = sshll.u32 %s147_s0, 4  ;;  %s65_s19 = int_to_ptr.vmem [resolvable:$true] %s64_s19 }
  0x1c   :  { %v50_v6 = vunpack.c.0.s8 %v49_v2  ;;  %s118_s1 = scalar_lea.vmem %s65_s19, 64  ;;  %p123_p11 = scmp.lt.s32.totalorder %s65_s19, %s65_s19 }
  0x1d   :  { %v41_v4 = vsub.s32 0, %v40_v3  ;;  %v45_v5 = vsub.s32 1, %v40_v3  ;;  %p119_p10 = scmp.ne.s32.totalorder %s65_s19, %s118_s1  ;;  %p124_p12 = scmp.lt.s32.totalorder %s118_s1, %s118_s1 }
  0x1e   :  { %v53_v10 = vsub.s32 %v50_v6, %v40_v3 }
  0x1f   :  { %v42_v8 = vrot.slane %v37_v7, %v41_v4  ;;  %v46_v9 = vrot.slane %v37_v7, %v45_v5  ;;  %p125_p13 = por %p124_p12, %p123_p11 }
  0x21   :  { %v47_v11 = vcombine.low %v42_v8, %v46_v9  ;;  %p126_p0 = pnand %p125_p13, %p119_p10 }
  0x23   :  { %v54_v13 = vrot.slane %v47_v11, %v53_v10 }
  0x25   :  { %v56_v14 = vadd.f32 %v54_v13, %v36_v12 }
  0x27   :  { %57 = vst [vmem:[#allocation7] sm:$0xf] %v56_v14 }
  0x28   :  { %129 = shalt.err (!%p126_p0)
}
  0x29   :  { %67 = dma.vmem_to_hbm [thread:$0]  %s65_s19, 64, %s174_s2, [#allocation4]  }
  0x2a   :  { %142 = dma.done.wait [#allocation4], 64  }
  0x2b   :  { %143 = vsyncadd [#allocation4], 4294967232 }
  0x2c   :  { %71 = vsyncpa [#allocation3], 1 }
  0x2d   :  { %72 = vsyncpa [#allocation6], 1 }
  0x2e   :  { %73 = vsyncpa [#allocation4], 1 }

</bundles_post_ra>
